<compile_context>
chip_gen: v5e
topology: v5e:2x2
jax: 0.10.0
libtpu: 0.0.40
codegen_flags: <defaults>
</compile_context>

<pallas_src>
import math
import functools

import jax
import jax.numpy as jnp
from jax.experimental import pallas as pl
from jax.experimental.pallas import tpu as pltpu

LANE = 128


def _round_up(v, m):
    return (v + m - 1) // m * m


def _vmem_limit_bytes():
    """Generation-aware per-TensorCore VMEM budget (v7x: 64 MiB, v5e/v6e: 128 MiB)."""
    try:
        cap = int(pltpu.get_tpu_info().vmem_capacity_bytes)
    except Exception:
        cap = 64 * 1024 * 1024  # conservative (v7x-sized) fallback
    return min(cap * 3 // 4, 100 * 1024 * 1024)


_VMEM_LIMIT = _vmem_limit_bytes()


# ------------------------- Phase 1: support = x @ W -------------------------

def _support_kernel(x_ref, w_ref, s_ref):
    s_ref[...] = jnp.dot(
        x_ref[...], w_ref[...], preferred_element_type=jnp.float32
    )


def _phase1_tile(n_pad, f_in_pad, f_pad, vmem_limit):
    tm = LANE
    for t in (2048, 1024, 512, 256, 128):
        if n_pad % t == 0:
            tm = t
            break

    def cost(t):  # double-buffered x block + W + f32 out block
        return 2 * (t * f_in_pad * 2 + f_in_pad * f_pad * 2 + t * f_pad * 4)

    while tm > LANE and cost(tm) > vmem_limit // 2:
        tm //= 2
    return tm


def _compute_support(x_p, w_p, *, tm, vmem_limit):
    n_pad, f_in_pad = x_p.shape
    f_pad = w_p.shape[1]
    flops = 2 * n_pad * f_in_pad * f_pad
    bytes_accessed = (
        n_pad * f_in_pad * 2 + f_in_pad * f_pad * 2 + n_pad * f_pad * 4
    )
    return pl.pallas_call(
        _support_kernel,
        out_shape=jax.ShapeDtypeStruct((n_pad, f_pad), jnp.float32),
        grid_spec=pltpu.PrefetchScalarGridSpec(
            num_scalar_prefetch=0,
            grid=(n_pad // tm,),
            in_specs=[
                pl.BlockSpec((tm, f_in_pad), lambda i: (i, 0)),
                pl.BlockSpec((f_in_pad, f_pad), lambda i: (0, 0)),
            ],
            out_specs=pl.BlockSpec((tm, f_pad), lambda i: (i, 0)),
        ),
        compiler_params=pltpu.CompilerParams(
            dimension_semantics=("parallel",),
            vmem_limit_bytes=vmem_limit,
        ),
        cost_estimate=pl.CostEstimate(
            flops=flops, transcendentals=0, bytes_accessed=bytes_accessed
        ),
    )(x_p, w_p)


# -------------------- Phase 2: out = relu(adj @ support) --------------------

def _aggregate_resident_kernel(adj_ref, s_ref, o_ref, *, tk):
    """support block is the full (VMEM-resident) array; k-chunk sliced in-kernel."""
    k = pl.program_id(1)

    @pl.when(k == 0)
    def _():
        o_ref[...] = jnp.zeros_like(o_ref)

    start = pl.multiple_of(k * tk, tk)
    s_blk = s_ref[pl.ds(start, tk), :].astype(jnp.bfloat16)
    o_ref[...] += jnp.dot(
        adj_ref[...].astype(jnp.bfloat16), s_blk,
        preferred_element_type=jnp.float32,
    )

    @pl.when(k == pl.num_programs(1) - 1)
    def _():
        o_ref[...] = jnp.maximum(o_ref[...], 0.0)


def _aggregate_tiled_kernel(adj_ref, s_ref, o_ref):
    """Fallback: support streamed in (tk, f_pad) blocks."""
    k = pl.program_id(1)

    @pl.when(k == 0)
    def _():
        o_ref[...] = jnp.zeros_like(o_ref)

    o_ref[...] += jnp.dot(
        adj_ref[...].astype(jnp.bfloat16),
        s_ref[...].astype(jnp.bfloat16),
        preferred_element_type=jnp.float32,
    )

    @pl.when(k == pl.num_programs(1) - 1)
    def _():
        o_ref[...] = jnp.maximum(o_ref[...], 0.0)


def _phase2_tiles(n):
    n128 = _round_up(n, LANE)
    tm = min(512, n128)
    # Keep >= 2 row tiles when possible so both v7x TensorCores get work.
    if tm == n128 and n128 > LANE and (n128 // 2) % LANE == 0:
        tm = n128 // 2
    tk = min(512, n128)
    return tm, tk


def _aggregate(adj_p, support_p, *, tm, tk, vmem_limit):
    n_row_pad, n_col_pad = adj_p.shape
    f_pad = support_p.shape[1]
    adj_bytes = adj_p.dtype.itemsize
    sup_bytes = support_p.dtype.itemsize  # f32

    # Can the whole support stay VMEM-resident?  Budget 2x for the support
    # block (Pallas may double-buffer even constant-index blocks) plus the
    # double-buffered adj and output tiles.
    resident_cost = (
        2 * n_col_pad * f_pad * sup_bytes
        + 2 * tm * tk * adj_bytes
        + 2 * tm * f_pad * 4
    )
    resident = resident_cost <= (vmem_limit * 8) // 10

    if resident:
        kernel = functools.partial(_aggregate_resident_kernel, tk=tk)
        s_spec = pl.BlockSpec((n_col_pad, f_pad), lambda i, k: (0, 0))
        sup_stream = n_col_pad * f_pad * sup_bytes
    else:
        kernel = _aggregate_tiled_kernel
        s_spec = pl.BlockSpec((tk, f_pad), lambda i, k: (k, 0))
        sup_stream = (n_row_pad // tm) * n_col_pad * f_pad * sup_bytes

    flops = 2 * n_row_pad * n_col_pad * f_pad
    bytes_accessed = (
        n_row_pad * n_col_pad * adj_bytes + sup_stream + n_row_pad * f_pad * 4
    )

    return pl.pallas_call(
        kernel,
        out_shape=jax.ShapeDtypeStruct((n_row_pad, f_pad), jnp.float32),
        grid_spec=pltpu.PrefetchScalarGridSpec(
            num_scalar_prefetch=0,
            grid=(n_row_pad // tm, n_col_pad // tk),
            in_specs=[
                pl.BlockSpec((tm, tk), lambda i, k: (i, k)),
                s_spec,
            ],
            out_specs=pl.BlockSpec((tm, f_pad), lambda i, k: (i, 0)),
        ),
        compiler_params=pltpu.CompilerParams(
            dimension_semantics=("parallel", "arbitrary"),
            vmem_limit_bytes=vmem_limit,
        ),
        cost_estimate=pl.CostEstimate(
            flops=flops, transcendentals=0, bytes_accessed=bytes_accessed
        ),
    )(adj_p, support_p)


# --------------------------------- Wrapper ----------------------------------

@jax.jit
def gcn_forward(x, weight, adj):
    """relu(adj @ (x @ weight)) — GraphConvolutionBase.forward."""
    n, f_in = x.shape
    f_out = weight.shape[1]
    assert adj.shape == (n, n)
    assert weight.shape[0] == f_in

    out_dtype = x.dtype
    vmem_limit = _VMEM_LIMIT

    tm2, tk2 = _phase2_tiles(n)
    n_row_pad = _round_up(n, tm2)
    n_col_pad = _round_up(n, tk2)

    f_in_pad = _round_up(f_in, LANE)
    f_pad = _round_up(f_out, LANE)

    tm1 = _phase1_tile(n_col_pad, f_in_pad, f_pad, vmem_limit)

    # Small operands: pad + cast to bf16 on the host (zero padding is exact
    # for matmul + relu).
    x_p = jnp.pad(x, ((0, n_col_pad - n), (0, f_in_pad - f_in))).astype(jnp.bfloat16)
    w_p = jnp.pad(weight, ((0, f_in_pad - f_in), (0, f_pad - f_out))).astype(jnp.bfloat16)

    # adj dominates HBM traffic: avoid any extra host-side pass when its shape
    # already matches (cast to bf16 in-kernel instead); otherwise fuse the
    # unavoidable pad with a bf16 cast in a single pass.
    if n_row_pad == n and n_col_pad == n:
        adj_p = adj
    else:
        adj_p = jnp.pad(
            adj, ((0, n_row_pad - n), (0, n_col_pad - n))
        ).astype(jnp.bfloat16)

    support_p = _compute_support(x_p, w_p, tm=tm1, vmem_limit=vmem_limit)  # f32
    out_p = _aggregate(adj_p, support_p, tm=tm2, tk=tk2, vmem_limit=vmem_limit)

    out = out_p[:n, :f_out]
    if out_dtype != jnp.float32:
        out = out.astype(out_dtype)
    return out


def xavier_uniform(key, in_features, out_features, dtype=jnp.float32):
    # Matches torch.nn.init.xavier_uniform_ for an (in, out) weight.
    bound = math.sqrt(6.0 / (in_features + out_features))
    return jax.random.uniform(
        key, (in_features, out_features), dtype=dtype, minval=-bound, maxval=bound
    )


if __name__ == "__main__":
    key = jax.random.PRNGKey(0)
    k_x, k_adj, k_w = jax.random.split(key, 3)

    N = 128      # number of graph nodes (small demo; kernels tile for large N)
    F_IN = 64    # in_features
    F_OUT = 32   # out_features

    x = jax.random.normal(k_x, (N, F_IN), dtype=jnp.float32)
    adj = jax.random.uniform(k_adj, (N, N), dtype=jnp.float32)
    weight = xavier_uniform(k_w, F_IN, F_OUT)

    out = jax.block_until_ready(gcn_forward(x, weight, adj))
    assert out.shape == (N, F_OUT)

    # Reference mimicking the kernel's bf16-input / f32-accumulate numerics
    # (support kept in f32, cast to bf16 only at the phase-2 MXU input).
    xb = x.astype(jnp.bfloat16).astype(jnp.float32)
    wb = weight.astype(jnp.bfloat16).astype(jnp.float32)
    sb = (xb @ wb).astype(jnp.bfloat16).astype(jnp.float32)
    ab = adj.astype(jnp.bfloat16).astype(jnp.float32)
    ref_bf16 = jnp.maximum(ab @ sb, 0.0)
    assert jnp.allclose(out, ref_bf16, rtol=1e-2, atol=1e-2), "mismatch vs bf16 reference"

    # Exact f32 reference (loose tolerance; quantifies the bf16-MXU error).
    support_f32 = jnp.matmul(x, weight, precision="highest")
    ref_f32 = jnp.maximum(jnp.matmul(adj, support_f32, precision="highest"), 0.0)
    assert jnp.allclose(out, ref_f32, rtol=5e-2, atol=5e-1), "mismatch vs f32 reference"

    print("KERNEL_OK")
</pallas_src>

<mosaic_0001>
module attributes {stable_mosaic.version = 11 : i64} {
  func.func @_aggregate_resident_kernel(%arg0: i32, %arg1: i32, %arg2: memref<128x128xf32, #tpu.memory_space<vmem>>, %arg3: memref<128x128xf32, #tpu.memory_space<vmem>>, %arg4: memref<128x128xf32, #tpu.memory_space<vmem>>) attributes {dimension_semantics = [#tpu.dimension_semantics<parallel>, #tpu.dimension_semantics<arbitrary>], iteration_bounds = array<i64: 1, 1>, scalar_prefetch = 0 : i64, scratch_operands = 0 : i64, tpu.core_type = #tpu.core_type<tc>, window_params = [{transform_indices = @transform_0, window_bounds = array<i64: 128, 128>}, {pipeline_mode = #tpu.pipeline_mode<synchronous>, transform_indices = @transform_1, window_bounds = array<i64: 128, 128>}, {transform_indices = @transform_2, window_bounds = array<i64: 128, 128>}]} {
    %c0_i32 = arith.constant 0 : i32
    %0 = arith.cmpi eq, %arg1, %c0_i32 : i32
    %1 = arith.extui %0 : i1 to i32
    %c0_i32_0 = arith.constant 0 : i32
    %2 = arith.cmpi ne, %1, %c0_i32_0 : i32
    scf.if %2 {
      %cst_9 = arith.constant 0.000000e+00 : f32
      %17 = vector.broadcast %cst_9 : f32 to vector<128x128xf32>
      %c0_10 = arith.constant 0 : index
      %c0_11 = arith.constant 0 : index
      %18 = vector.load %arg4[%c0_10, %c0_11] : memref<128x128xf32, #tpu.memory_space<vmem>>, vector<128x128xf32>
      tpu.vector_store %arg4[%c0_10, %c0_11], %17 {strides = array<i32>} : memref<128x128xf32, #tpu.memory_space<vmem>>, vector<128x128xf32>,
    } else {
    }
    %c128_i32 = arith.constant 128 : i32
    %3 = arith.muli %arg1, %c128_i32 : i32
    %4 = tpu.assume_multiple %3, 128 : i32
    %5 = arith.index_cast %4 : i32 to index
    %c0 = arith.constant 0 : index
    %6 = vector.load %arg3[%5, %c0] : memref<128x128xf32, #tpu.memory_space<vmem>>, vector<128x128xf32>
    %7 = arith.truncf %6 : vector<128x128xf32> to vector<128x128xbf16>
    %c0_1 = arith.constant 0 : index
    %c0_2 = arith.constant 0 : index
    %8 = vector.load %arg4[%c0_1, %c0_2] : memref<128x128xf32, #tpu.memory_space<vmem>>, vector<128x128xf32>
    %c0_3 = arith.constant 0 : index
    %c0_4 = arith.constant 0 : index
    %9 = vector.load %arg2[%c0_3, %c0_4] : memref<128x128xf32, #tpu.memory_space<vmem>>, vector<128x128xf32>
    %10 = arith.truncf %9 : vector<128x128xf32> to vector<128x128xbf16>
    %cst = arith.constant dense<0.000000e+00> : vector<128x128xf32>
    %11 = tpu.matmul %10, %7, %cst {dimension_numbers = #tpu.dot_dimension_numbers<[1], [0], [0], [1], [0, 0, 1, 1], [], []>} : vector<128x128xbf16>, vector<128x128xbf16>, vector<128x128xf32> -> vector<128x128xf32>
    %12 = arith.addf %8, %11 : vector<128x128xf32>
    %c0_5 = arith.constant 0 : index
    %c0_6 = arith.constant 0 : index
    %13 = vector.load %arg4[%c0_5, %c0_6] : memref<128x128xf32, #tpu.memory_space<vmem>>, vector<128x128xf32>
    tpu.vector_store %arg4[%c0_5, %c0_6], %12 {strides = array<i32>} : memref<128x128xf32, #tpu.memory_space<vmem>>, vector<128x128xf32>,
    %c0_i32_7 = arith.constant 0 : i32
    %14 = arith.cmpi eq, %arg1, %c0_i32_7 : i32
    %15 = arith.extui %14 : i1 to i32
    %c0_i32_8 = arith.constant 0 : i32
    %16 = arith.cmpi ne, %15, %c0_i32_8 : i32
    scf.if %16 {
      %c0_9 = arith.constant 0 : index
      %c0_10 = arith.constant 0 : index
      %17 = vector.load %arg4[%c0_9, %c0_10] : memref<128x128xf32, #tpu.memory_space<vmem>>, vector<128x128xf32>
      %cst_11 = arith.constant 0.000000e+00 : f32
      %18 = vector.broadcast %cst_11 : f32 to vector<128x128xf32>
      %19 = arith.maximumf %17, %18 : vector<128x128xf32>
      %c0_12 = arith.constant 0 : index
      %c0_13 = arith.constant 0 : index
      %20 = vector.load %arg4[%c0_12, %c0_13] : memref<128x128xf32, #tpu.memory_space<vmem>>, vector<128x128xf32>
      tpu.vector_store %arg4[%c0_12, %c0_13], %19 {strides = array<i32>} : memref<128x128xf32, #tpu.memory_space<vmem>>, vector<128x128xf32>,
    } else {
    }
    return
  }
  func.func @transform_0(%arg0: i32, %arg1: i32) -> (i32, i32) {
    %c0_i32 = arith.constant 0 : i32
    return %arg0, %arg1 : i32, i32
  }
  func.func @transform_1(%arg0: i32, %arg1: i32) -> (i32, i32) {
    %c0_i32 = arith.constant 0 : i32
    %c0_i32_0 = arith.constant 0 : i32
    %c0_i32_1 = arith.constant 0 : i32
    return %c0_i32, %c0_i32_0 : i32, i32
  }
  func.func @transform_2(%arg0: i32, %arg1: i32) -> (i32, i32) {
    %c0_i32 = arith.constant 0 : i32
    %c0_i32_0 = arith.constant 0 : i32
    return %arg0, %c0_i32 : i32, i32
  }
}

module attributes {stable_mosaic.version = 11 : i64} {
  func.func @_support_kernel(%arg0: i32, %arg1: memref<128x128xbf16, #tpu.memory_space<vmem>>, %arg2: memref<128x128xbf16, #tpu.memory_space<vmem>>, %arg3: memref<128x128xf32, #tpu.memory_space<vmem>>) attributes {dimension_semantics = [#tpu.dimension_semantics<parallel>], iteration_bounds = array<i64: 1>, scalar_prefetch = 0 : i64, scratch_operands = 0 : i64, tpu.core_type = #tpu.core_type<tc>, window_params = [{transform_indices = @transform_0, window_bounds = array<i64: 128, 128>}, {pipeline_mode = #tpu.pipeline_mode<synchronous>, transform_indices = @transform_1, window_bounds = array<i64: 128, 128>}, {transform_indices = @transform_2, window_bounds = array<i64: 128, 128>}]} {
    %c0 = arith.constant 0 : index
    %c0_0 = arith.constant 0 : index
    %0 = vector.load %arg1[%c0, %c0_0] : memref<128x128xbf16, #tpu.memory_space<vmem>>, vector<128x128xbf16>
    %c0_1 = arith.constant 0 : index
    %c0_2 = arith.constant 0 : index
    %1 = vector.load %arg2[%c0_1, %c0_2] : memref<128x128xbf16, #tpu.memory_space<vmem>>, vector<128x128xbf16>
    %cst = arith.constant dense<0.000000e+00> : vector<128x128xf32>
    %2 = tpu.matmul %0, %1, %cst {dimension_numbers = #tpu.dot_dimension_numbers<[1], [0], [0], [1], [0, 0, 1, 1], [], []>} : vector<128x128xbf16>, vector<128x128xbf16>, vector<128x128xf32> -> vector<128x128xf32>
    %c0_3 = arith.constant 0 : index
    %c0_4 = arith.constant 0 : index
    %3 = vector.load %arg3[%c0_3, %c0_4] : memref<128x128xf32, #tpu.memory_space<vmem>>, vector<128x128xf32>
    tpu.vector_store %arg3[%c0_3, %c0_4], %2 {strides = array<i32>} : memref<128x128xf32, #tpu.memory_space<vmem>>, vector<128x128xf32>,
    return
  }
  func.func @transform_0(%arg0: i32) -> (i32, i32) {
    %c0_i32 = arith.constant 0 : i32
    %c0_i32_0 = arith.constant 0 : i32
    return %arg0, %c0_i32 : i32, i32
  }
  func.func @transform_1(%arg0: i32) -> (i32, i32) {
    %c0_i32 = arith.constant 0 : i32
    %c0_i32_0 = arith.constant 0 : i32
    %c0_i32_1 = arith.constant 0 : i32
    return %c0_i32, %c0_i32_0 : i32, i32
  }
  func.func @transform_2(%arg0: i32) -> (i32, i32) {
    %c0_i32 = arith.constant 0 : i32
    %c0_i32_0 = arith.constant 0 : i32
    return %arg0, %c0_i32 : i32, i32
  }
}

</mosaic_0001>

<bundles_post_ra>
// kernel: gcn_forward.2
= control target key start
LH: loop header
LB: loop body
LE: loop exit
PB: predicated region body
PF: predicated region fallthrough
CT: control target
= control target key end

     0   :  { %s423_s1 = inlined_call_operand.vmem [shape: bf16[128,128], index: 1, kind: input, shape index: {}]   ;;  %s424_s0 = inlined_call_operand.vmem [shape: bf16[128,128], index: 0, kind: input, shape index: {}]   ;;  %s425_s2 = inlined_call_operand.vmem [shape: f32[128,128], index: 2, kind: output, shape index: {}]  }
   0x1   :  { %v287_v0 = vld [vmem:[%s423_s1 + $0x38] sm:$0xff]  ;;  %v286_v1 = vld [vmem:[%s423_s1 + $0x30] sm:$0xff]  ;;  %v285_v2 = vld [vmem:[%s423_s1 + $0x28] sm:$0xff] }
   0x2   :  { %139 = vmatpush.bf16.msra.mxu0 %v287_v0  ;;  %288 = vmatpush.bf16.msra.mxu1 %v287_v0  ;;  %v284_v3 = vld [vmem:[%s423_s1 + $0x20] sm:$0xff]  ;;  %v283_v4 = vld [vmem:[%s423_s1 + $0x18] sm:$0xff]  ;;  %v282_v5 = vld [vmem:[%s423_s1 + $0x10] sm:$0xff] }
   0x3   :  { %289 = vmatpush.bf16.msra.mxu2 %v287_v0  ;;  %290 = vmatpush.bf16.msra.mxu3 %v287_v0  ;;  %v281_v6 = vld [vmem:[%s423_s1 + $0x8] sm:$0xff]  ;;  %v280_v7 = vld [vmem:[%s423_s1] sm:$0xff]  ;;  %v274_v9 = vld [vmem:[%s424_s0 + $0x10] sm:$0xff] }
   0x4   :  { %v272_v8 = vld [vmem:[%s424_s0] sm:$0xff]  ;;  %v278_v11 = vld [vmem:[%s424_s0 + $0x30] sm:$0xff]  ;;  %v273_v12 = vld [vmem:[%s424_s0 + $0x8] sm:$0xff] }
   0x5   :  { %v276_v10 = vld [vmem:[%s424_s0 + $0x20] sm:$0xff]  ;;  %v275_v13 = vld [vmem:[%s424_s0 + $0x18] sm:$0xff]  ;;  %v277_v14 = vld [vmem:[%s424_s0 + $0x28] sm:$0xff] }
   0x6   :  { %140 = vmatpush.bf16.msra.mxu0 %v286_v1  ;;  %291 = vmatpush.bf16.msra.mxu1 %v286_v1  ;;  %v279_v15 = vld [vmem:[%s424_s0 + $0x38] sm:$0xff] }
   0x7   :  { %292 = vmatpush.bf16.msra.mxu2 %v286_v1  ;;  %293 = vmatpush.bf16.msra.mxu3 %v286_v1 }
   0xa   :  { %141 = vmatpush.bf16.msra.mxu0 %v285_v2  ;;  %294 = vmatpush.bf16.msra.mxu1 %v285_v2 }
   0xb   :  { %295 = vmatpush.bf16.msra.mxu2 %v285_v2  ;;  %296 = vmatpush.bf16.msra.mxu3 %v285_v2 }
   0xe   :  { %142 = vmatpush.bf16.msra.mxu0 %v284_v3  ;;  %297 = vmatpush.bf16.msra.mxu1 %v284_v3 }
   0xf   :  { %298 = vmatpush.bf16.msra.mxu2 %v284_v3  ;;  %299 = vmatpush.bf16.msra.mxu3 %v284_v3 }
  0x12   :  { %143 = vmatpush.bf16.msra.mxu0 %v283_v4  ;;  %300 = vmatpush.bf16.msra.mxu1 %v283_v4 }
  0x13   :  { %301 = vmatpush.bf16.msra.mxu2 %v283_v4  ;;  %302 = vmatpush.bf16.msra.mxu3 %v283_v4 }
  0x16   :  { %144 = vmatpush.bf16.msra.mxu0 %v282_v5  ;;  %303 = vmatpush.bf16.msra.mxu1 %v282_v5 }
  0x17   :  { %304 = vmatpush.bf16.msra.mxu2 %v282_v5  ;;  %305 = vmatpush.bf16.msra.mxu3 %v282_v5 }
  0x1a   :  { %145 = vmatpush.bf16.msra.mxu0 %v281_v6  ;;  %306 = vmatpush.bf16.msra.mxu1 %v281_v6 }
  0x1b   :  { %307 = vmatpush.bf16.msra.mxu2 %v281_v6  ;;  %308 = vmatpush.bf16.msra.mxu3 %v281_v6 }
  0x1e   :  { %146 = vmatpush.bf16.msra.mxu0 %v280_v7  ;;  %309 = vmatpush.bf16.msra.mxu1 %v280_v7 }
  0x1f   :  { %310 = vmatpush.bf16.msra.mxu2 %v280_v7  ;;  %311 = vmatpush.bf16.msra.mxu3 %v280_v7 }
  0x21   :  { %147 = vmatmul.bf16.vlgmr.msra.gmra.mxu0 %v272_v8  ;;  %157 = vmatmul.bf16.vlgmr.msra.gmra.mxu1 %v274_v9 }
  0x22   :  { %167 = vmatmul.bf16.vlgmr.msra.gmra.mxu2 %v276_v10  ;;  %177 = vmatmul.bf16.vlgmr.msra.gmra.mxu3 %v278_v11 }
  0x31   :  { %152 = vmatmul.bf16.gmra.mxu0 %v273_v12  ;;  %162 = vmatmul.bf16.gmra.mxu1 %v275_v13 }
  0x32   :  { %172 = vmatmul.bf16.gmra.mxu2 %v277_v14  ;;  %182 = vmatmul.bf16.gmra.mxu3 %v279_v15 }
  0x9e   :  { %v148_v16 = vpop.f32.mrf.mxu0  ;;  %v158_v17 = vpop.f32.mrf.mxu1 }
  0x9f   :  { %188 = vst [vmem:[%s425_s2] sm:$0xff] %v148_v16 }
  0xa0   :  { %192 = vst [vmem:[%s425_s2 + $0x20] sm:$0xff] %v158_v17 }
  0xa5   :  { %v168_v18 = vpop.f32.mrf.mxu2  ;;  %v178_v19 = vpop.f32.mrf.mxu3 }
  0xa6   :  { %196 = vst [vmem:[%s425_s2 + $0x40] sm:$0xff] %v168_v18  ;;  %v150_v20 = vpop.f32.mrf.mxu0  ;;  %v160_v21 = vpop.f32.mrf.mxu1 }
  0xa7   :  { %200 = vst [vmem:[%s425_s2 + $0x60] sm:$0xff] %v178_v19 }
  0xa8   :  { %189 = vst [vmem:[%s425_s2 + $0x8] sm:$0xff] %v150_v20 }
  0xa9   :  { %193 = vst [vmem:[%s425_s2 + $0x28] sm:$0xff] %v160_v21 }
  0xad   :  { %v170_v22 = vpop.f32.mrf.mxu2  ;;  %v180_v23 = vpop.f32.mrf.mxu3 }
  0xae   :  { %197 = vst [vmem:[%s425_s2 + $0x48] sm:$0xff] %v170_v22  ;;  %v153_v24 = vpop.f32.mrf.mxu0  ;;  %v163_v25 = vpop.f32.mrf.mxu1 }
  0xaf   :  { %201 = vst [vmem:[%s425_s2 + $0x68] sm:$0xff] %v180_v23 }
  0xb0   :  { %190 = vst [vmem:[%s425_s2 + $0x10] sm:$0xff] %v153_v24 }
  0xb1   :  { %194 = vst [vmem:[%s425_s2 + $0x30] sm:$0xff] %v163_v25 }
  0xb5   :  { %v173_v26 = vpop.f32.mrf.mxu2  ;;  %v183_v27 = vpop.f32.mrf.mxu3 }
  0xb6   :  { %198 = vst [vmem:[%s425_s2 + $0x50] sm:$0xff] %v173_v26  ;;  %v155_v28 = vpop.f32.mrf.mxu0  ;;  %v165_v29 = vpop.f32.mrf.mxu1 }
  0xb7   :  { %202 = vst [vmem:[%s425_s2 + $0x70] sm:$0xff] %v183_v27 }
  0xb8   :  { %191 = vst [vmem:[%s425_s2 + $0x18] sm:$0xff] %v155_v28 }
  0xb9   :  { %195 = vst [vmem:[%s425_s2 + $0x38] sm:$0xff] %v165_v29 }
  0xbd   :  { %v175_v30 = vpop.f32.mrf.mxu2  ;;  %v185_v31 = vpop.f32.mrf.mxu3 }
  0xbe   :  { %199 = vst [vmem:[%s425_s2 + $0x58] sm:$0xff] %v175_v30 }
  0xbf   :  { %203 = vst [vmem:[%s425_s2 + $0x78] sm:$0xff] %v185_v31 }

// kernel: gcn_forward.3
= control target key start
LH: loop header
LB: loop body
LE: loop exit
PB: predicated region body
PF: predicated region fallthrough
CT: control target
= control target key end

     0   :  { %s417_s1 = inlined_call_operand.vmem [shape: f32[128,128], index: 1, kind: input, shape index: {}]   ;;  %s418_s0 = inlined_call_operand.vmem [shape: f32[128,128], index: 0, kind: input, shape index: {}]   ;;  %s419_s2 = inlined_call_operand.vmem [shape: f32[128,128], index: 2, kind: output, shape index: {}]  }
   0x1   :  { %v47_v0 = vld [vmem:[%s417_s1 + $0x70] sm:$0xff]  ;;  %v48_v1 = vld [vmem:[%s417_s1 + $0x78] sm:$0xff]  ;;  %v45_v2 = vld [vmem:[%s417_s1 + $0x60] sm:$0xff] }
   0x2   :  { %v56_v3 = vpack.c.bf16 %v48_v1, %v47_v0  ;;  %v46_v4 = vld [vmem:[%s417_s1 + $0x68] sm:$0xff]  ;;  %v43_v6 = vld [vmem:[%s417_s1 + $0x50] sm:$0xff]  ;;  %v44_v7 = vld [vmem:[%s417_s1 + $0x58] sm:$0xff] }
   0x3   :  { %v55_v5 = vpack.c.bf16 %v46_v4, %v45_v2  ;;  %v54_v8 = vpack.c.bf16 %v44_v7, %v43_v6  ;;  %v41_v9 = vld [vmem:[%s417_s1 + $0x40] sm:$0xff]  ;;  %v42_v10 = vld [vmem:[%s417_s1 + $0x48] sm:$0xff]  ;;  %v39_v12 = vld [vmem:[%s417_s1 + $0x30] sm:$0xff] }
   0x4   :  { %97 = vmatpush.bf16.msra.mxu0 %v56_v3  ;;  %233 = vmatpush.bf16.msra.mxu1 %v56_v3  ;;  %v53_v11 = vpack.c.bf16 %v42_v10, %v41_v9  ;;  %v40_v13 = vld [vmem:[%s417_s1 + $0x38] sm:$0xff]  ;;  %v37_v15 = vld [vmem:[%s417_s1 + $0x20] sm:$0xff]  ;;  %v38_v16 = vld [vmem:[%s417_s1 + $0x28] sm:$0xff] }
   0x5   :  { %234 = vmatpush.bf16.msra.mxu2 %v56_v3  ;;  %235 = vmatpush.bf16.msra.mxu3 %v56_v3  ;;  %v52_v14 = vpack.c.bf16 %v40_v13, %v39_v12  ;;  %v51_v17 = vpack.c.bf16 %v38_v16, %v37_v15  ;;  %v35_v18 = vld [vmem:[%s417_s1 + $0x10] sm:$0xff]  ;;  %v36_v19 = vld [vmem:[%s417_s1 + $0x18] sm:$0xff]  ;;  %v33_v21 = vld [vmem:[%s417_s1] sm:$0xff] }
   0x6   :  { %v50_v20 = vpack.c.bf16 %v36_v19, %v35_v18  ;;  %v34_v22 = vld [vmem:[%s417_s1 + $0x8] sm:$0xff]  ;;  %v73_v23 = vld [vmem:[%s418_s0] sm:$0xff]  ;;  %v75_v36 = vld [vmem:[%s418_s0 + $0x10] sm:$0xff] }
   0x7   :  { %v74_v24 = vld [vmem:[%s418_s0 + $0x8] sm:$0xff]  ;;  %v49_v25 = vpack.c.bf16 %v34_v22, %v33_v21  ;;  %v77_v26 = vld [vmem:[%s418_s0 + $0x20] sm:$0xff]  ;;  %v76_v37 = vld [vmem:[%s418_s0 + $0x18] sm:$0xff] }
   0x8   :  { %98 = vmatpush.bf16.msra.mxu0 %v55_v5  ;;  %236 = vmatpush.bf16.msra.mxu1 %v55_v5  ;;  %v78_v27 = vld [vmem:[%s418_s0 + $0x28] sm:$0xff]  ;;  %v81_v28 = vld [vmem:[%s418_s0 + $0x40] sm:$0xff]  ;;  %v89_v32 = vpack.c.bf16 %v74_v24, %v73_v23  ;;  %v79_v38 = vld [vmem:[%s418_s0 + $0x30] sm:$0xff]  ;;  %v90_v44 = vpack.c.bf16 %v76_v37, %v75_v36 }
   0x9   :  { %237 = vmatpush.bf16.msra.mxu2 %v55_v5  ;;  %238 = vmatpush.bf16.msra.mxu3 %v55_v5  ;;  %v82_v29 = vld [vmem:[%s418_s0 + $0x48] sm:$0xff]  ;;  %v85_v30 = vld [vmem:[%s418_s0 + $0x60] sm:$0xff]  ;;  %v91_v33 = vpack.c.bf16 %v78_v27, %v77_v26  ;;  %v80_v39 = vld [vmem:[%s418_s0 + $0x38] sm:$0xff] }
   0xa   :  { %v86_v31 = vld [vmem:[%s418_s0 + $0x68] sm:$0xff]  ;;  %v93_v34 = vpack.c.bf16 %v82_v29, %v81_v28  ;;  %v83_v40 = vld [vmem:[%s418_s0 + $0x50] sm:$0xff]  ;;  %v84_v41 = vld [vmem:[%s418_s0 + $0x58] sm:$0xff]  ;;  %v92_v45 = vpack.c.bf16 %v80_v39, %v79_v38 }
   0xb   :  { %v95_v35 = vpack.c.bf16 %v86_v31, %v85_v30  ;;  %v87_v42 = vld [vmem:[%s418_s0 + $0x70] sm:$0xff]  ;;  %v88_v43 = vld [vmem:[%s418_s0 + $0x78] sm:$0xff]  ;;  %v94_v46 = vpack.c.bf16 %v84_v41, %v83_v40 }
   0xc   :  { %99 = vmatpush.bf16.msra.mxu0 %v54_v8  ;;  %239 = vmatpush.bf16.msra.mxu1 %v54_v8  ;;  %v96_v47 = vpack.c.bf16 %v88_v43, %v87_v42 }
   0xd   :  { %240 = vmatpush.bf16.msra.mxu2 %v54_v8  ;;  %241 = vmatpush.bf16.msra.mxu3 %v54_v8 }
  0x10   :  { %100 = vmatpush.bf16.msra.mxu0 %v53_v11  ;;  %242 = vmatpush.bf16.msra.mxu1 %v53_v11 }
  0x11   :  { %243 = vmatpush.bf16.msra.mxu2 %v53_v11  ;;  %244 = vmatpush.bf16.msra.mxu3 %v53_v11 }
  0x14   :  { %101 = vmatpush.bf16.msra.mxu0 %v52_v14  ;;  %245 = vmatpush.bf16.msra.mxu1 %v52_v14 }
  0x15   :  { %246 = vmatpush.bf16.msra.mxu2 %v52_v14  ;;  %247 = vmatpush.bf16.msra.mxu3 %v52_v14 }
  0x18   :  { %102 = vmatpush.bf16.msra.mxu0 %v51_v17  ;;  %248 = vmatpush.bf16.msra.mxu1 %v51_v17 }
  0x19   :  { %249 = vmatpush.bf16.msra.mxu2 %v51_v17  ;;  %250 = vmatpush.bf16.msra.mxu3 %v51_v17 }
  0x1c   :  { %103 = vmatpush.bf16.msra.mxu0 %v50_v20  ;;  %251 = vmatpush.bf16.msra.mxu1 %v50_v20 }
  0x1d   :  { %252 = vmatpush.bf16.msra.mxu2 %v50_v20  ;;  %253 = vmatpush.bf16.msra.mxu3 %v50_v20 }
  0x20   :  { %104 = vmatpush.bf16.msra.mxu0 %v49_v25  ;;  %254 = vmatpush.bf16.msra.mxu1 %v49_v25 }
  0x21   :  { %255 = vmatpush.bf16.msra.mxu2 %v49_v25  ;;  %256 = vmatpush.bf16.msra.mxu3 %v49_v25 }
  0x23   :  { %105 = vmatmul.bf16.vlgmr.msra.gmra.mxu0 %v89_v32  ;;  %115 = vmatmul.bf16.vlgmr.msra.gmra.mxu1 %v91_v33 }
  0x24   :  { %125 = vmatmul.bf16.vlgmr.msra.gmra.mxu2 %v93_v34  ;;  %135 = vmatmul.bf16.vlgmr.msra.gmra.mxu3 %v95_v35 }
  0x33   :  { %110 = vmatmul.bf16.gmra.mxu0 %v90_v44  ;;  %120 = vmatmul.bf16.gmra.mxu1 %v92_v45 }
  0x34   :  { %130 = vmatmul.bf16.gmra.mxu2 %v94_v46  ;;  %140 = vmatmul.bf16.gmra.mxu3 %v96_v47 }
  0xa0   :  { %v106_v48 = vpop.f32.mrf.mxu0  ;;  %v116_v49 = vpop.f32.mrf.mxu1 }
  0xa1   :  { %v197_v50 = vmax.f32 %v106_v48, 0.0  ;;  %v201_v51 = vmax.f32 %v116_v49, 0.0 }
  0xa3   :  { %213 = vst [vmem:[%s419_s2] sm:$0xff] %v197_v50 }
  0xa4   :  { %217 = vst [vmem:[%s419_s2 + $0x20] sm:$0xff] %v201_v51 }
  0xa7   :  { %v126_v52 = vpop.f32.mrf.mxu2  ;;  %v136_v53 = vpop.f32.mrf.mxu3 }
  0xa8   :  { %v108_v54 = vpop.f32.mrf.mxu0  ;;  %v118_v55 = vpop.f32.mrf.mxu1  ;;  %v205_v56 = vmax.f32 %v126_v52, 0.0  ;;  %v209_v57 = vmax.f32 %v136_v53, 0.0 }
  0xa9   :  { %v198_v58 = vmax.f32 %v108_v54, 0.0  ;;  %v202_v59 = vmax.f32 %v118_v55, 0.0 }
  0xaa   :  { %221 = vst [vmem:[%s419_s2 + $0x40] sm:$0xff] %v205_v56 }
  0xab   :  { %225 = vst [vmem:[%s419_s2 + $0x60] sm:$0xff] %v209_v57 }
  0xac   :  { %214 = vst [vmem:[%s419_s2 + $0x8] sm:$0xff] %v198_v58 }
  0xad   :  { %218 = vst [vmem:[%s419_s2 + $0x28] sm:$0xff] %v202_v59 }
  0xaf   :  { %v128_v60 = vpop.f32.mrf.mxu2  ;;  %v138_v61 = vpop.f32.mrf.mxu3 }
  0xb0   :  { %v111_v62 = vpop.f32.mrf.mxu0  ;;  %v121_v63 = vpop.f32.mrf.mxu1  ;;  %v206_v0 = vmax.f32 %v128_v60, 0.0  ;;  %v210_v1 = vmax.f32 %v138_v61, 0.0 }
  0xb1   :  { %v199_v2 = vmax.f32 %v111_v62, 0.0  ;;  %v203_v3 = vmax.f32 %v121_v63, 0.0 }
  0xb2   :  { %222 = vst [vmem:[%s419_s2 + $0x48] sm:$0xff] %v206_v0 }
  0xb3   :  { %226 = vst [vmem:[%s419_s2 + $0x68] sm:$0xff] %v210_v1 }
  0xb4   :  { %215 = vst [vmem:[%s419_s2 + $0x10] sm:$0xff] %v199_v2 }
  0xb5   :  { %219 = vst [vmem:[%s419_s2 + $0x30] sm:$0xff] %v203_v3 }
  0xb7   :  { %v131_v4 = vpop.f32.mrf.mxu2  ;;  %v141_v5 = vpop.f32.mrf.mxu3 }
  0xb8   :  { %v113_v6 = vpop.f32.mrf.mxu0  ;;  %v123_v7 = vpop.f32.mrf.mxu1  ;;  %v207_v8 = vmax.f32 %v131_v4, 0.0  ;;  %v211_v9 = vmax.f32 %v141_v5, 0.0 }
  0xb9   :  { %v200_v10 = vmax.f32 %v113_v6, 0.0  ;;  %v204_v11 = vmax.f32 %v123_v7, 0.0 }
  0xba   :  { %223 = vst [vmem:[%s419_s2 + $0x50] sm:$0xff] %v207_v8 }
  0xbb   :  { %227 = vst [vmem:[%s419_s2 + $0x70] sm:$0xff] %v211_v9 }
  0xbc   :  { %216 = vst [vmem:[%s419_s2 + $0x18] sm:$0xff] %v200_v10 }
  0xbd   :  { %220 = vst [vmem:[%s419_s2 + $0x38] sm:$0xff] %v204_v11 }
  0xbf   :  { %v133_v12 = vpop.f32.mrf.mxu2  ;;  %v143_v13 = vpop.f32.mrf.mxu3 }
  0xc0   :  { %v208_v14 = vmax.f32 %v133_v12, 0.0  ;;  %v212_v15 = vmax.f32 %v143_v13, 0.0 }
  0xc2   :  { %224 = vst [vmem:[%s419_s2 + $0x58] sm:$0xff] %v208_v14 }
  0xc3   :  { %228 = vst [vmem:[%s419_s2 + $0x78] sm:$0xff] %v212_v15 }

</bundles_post_ra>
